<compile_context>
chip_gen: v7x
topology: tpu7x:2x2x1
jax: 0.10.0
libtpu: 0.0.40
codegen_flags: <defaults>
</compile_context>

<pallas_src>
import jax
import jax.numpy as jnp
from jax.experimental import pallas as pl
from jax.experimental.pallas import tpu as pltpu


def _round_up(n, m):
    return ((n + m - 1) // m) * m


def _physical_vmem_bytes():
    """Per-core VMEM capacity; conservative 64 MiB (v7x) fallback."""
    try:
        return int(pltpu.get_tpu_info().vmem_capacity_bytes)
    except Exception:
        return 64 << 20


# --------------------------------------------------------------------------
# Kernels
# --------------------------------------------------------------------------
def mlp_kernel_resident(x_ref, w1_ref, b1_ref, w2_ref, b2_ref, o_ref):
    """Both weight matrices VMEM-resident; one batch tile per grid step."""
    # fc1: (TB, In_p) @ (In_p, H_p) on the MXU, f32 accumulation.
    h = jnp.dot(x_ref[...], w1_ref[...], preferred_element_type=jnp.float32)
    # bias + ReLU in f32 on the VPU.
    h = jnp.maximum(h + b1_ref[...], 0.0)
    # fc2: (TB, H_p) @ (H_p, O_p) on the MXU, f32 accumulation.
    y = jnp.dot(h.astype(w2_ref.dtype), w2_ref[...],
                preferred_element_type=jnp.float32)
    y = y + b2_ref[...]
    # Sigmoid: exp + approximate reciprocal both issue on the EUP slot.
    o_ref[...] = pl.reciprocal(1.0 + jnp.exp(-y), approx=True).astype(o_ref.dtype)


def mlp_kernel_kstream(x_ref, w1_ref, b1_ref, w2_ref, b2_ref, o_ref, h_acc):
    """w1 streamed over the In (K) axis; fc1 accumulated in f32 scratch."""
    k = pl.program_id(1)

    @pl.when(k == 0)
    def _():
        h_acc[...] = jnp.zeros_like(h_acc)

    # Partial fc1 for this K slab: (TB, TK) @ (TK, H_p).
    h_acc[...] += jnp.dot(x_ref[...], w1_ref[...],
                          preferred_element_type=jnp.float32)

    @pl.when(k == pl.num_programs(1) - 1)
    def _():
        h = jnp.maximum(h_acc[...] + b1_ref[...], 0.0)
        y = jnp.dot(h.astype(w2_ref.dtype), w2_ref[...],
                    preferred_element_type=jnp.float32)
        y = y + b2_ref[...]
        o_ref[...] = pl.reciprocal(1.0 + jnp.exp(-y),
                                   approx=True).astype(o_ref.dtype)


# --------------------------------------------------------------------------
# Wrapper
# --------------------------------------------------------------------------
def mlp_forward(x, w1, b1, w2, b2, *, block_b=512, use_bf16=None,
                force_k_stream=False):
    """x: (B, In), w1: (In, H), b1: (1, H), w2: (H, O), b2: (1, O) -> (B, O)."""
    B, In = x.shape
    H = w1.shape[1]
    O = w2.shape[1]
    out_dtype = x.dtype

    # bf16 matmul operands by default for f32 inputs (f32 accumulate,
    # f32 bias/ReLU/sigmoid -- safe on v5e which has no bf16 VPU/EUP).
    if use_bf16 is None:
        use_bf16 = (x.dtype == jnp.float32)
    op_dtype = jnp.bfloat16 if use_bf16 else x.dtype
    op_bytes = jnp.dtype(op_dtype).itemsize
    out_bytes = jnp.dtype(out_dtype).itemsize

    # ---- lane-dense padding: all matmul dims to multiples of 128 lanes ----
    In_p = _round_up(In, 128)
    H_p = _round_up(H, 128)
    O_p = _round_up(O, 128)

    # ---- batch tile: 512-row default, 16-sublane granularity on bf16,
    #      snapped to 256 (MXU M dim on v6e/v7x) once large enough ---------
    sub = 16 if use_bf16 else 8
    TB = _round_up(min(max(block_b, 1), max(B, 1)), sub)
    if TB >= 256:
        TB = _round_up(TB, 256)
    Bp = _round_up(B, TB)

    # ---- zero-padded / cast operands (padding columns contribute 0) ------
    xp = jnp.zeros((Bp, In_p), op_dtype).at[:B, :In].set(x.astype(op_dtype))
    w1p = jnp.zeros((In_p, H_p), op_dtype).at[:In, :H].set(w1.astype(op_dtype))
    w2p = jnp.zeros((H_p, O_p), op_dtype).at[:H, :O].set(w2.astype(op_dtype))
    b1p = jnp.zeros((1, H_p), jnp.float32).at[:, :H].set(b1.astype(jnp.float32))
    b2p = jnp.zeros((1, O_p), jnp.float32).at[:, :O].set(b2.astype(jnp.float32))

    # ---- VMEM budget / path selection -------------------------------------
    phys_vmem = _physical_vmem_bytes()
    vmem_cap = (phys_vmem * 7) // 8          # leave compiler headroom

    resident_w_bytes = (In_p * H_p + H_p * O_p) * op_bytes + (H_p + O_p) * 4
    k_stream = force_k_stream or resident_w_bytes > (phys_vmem * 6) // 10

    if not k_stream:
        grid = (Bp // TB,)
        in_specs = [
            pl.BlockSpec((TB, In_p), lambda i: (i, 0)),    # x: streamed tiles
            pl.BlockSpec((In_p, H_p), lambda i: (0, 0)),   # w1: VMEM-resident
            pl.BlockSpec((1, H_p), lambda i: (0, 0)),      # b1: VMEM-resident
            pl.BlockSpec((H_p, O_p), lambda i: (0, 0)),    # w2: VMEM-resident
            pl.BlockSpec((1, O_p), lambda i: (0, 0)),      # b2: VMEM-resident
        ]
        out_specs = pl.BlockSpec((TB, O_p), lambda i: (i, 0))
        scratch_shapes = []
        kernel = mlp_kernel_resident
        dims = ("parallel",)                 # dual-TC sharding on v7x
        need = (2 * TB * In_p * op_bytes      # double-buffered x tiles
                + 2 * TB * O_p * out_bytes    # double-buffered out tiles
                + resident_w_bytes            # resident weights + biases
                + 2 * TB * H_p * 4)           # f32 intermediate h headroom
    else:
        # Stream w1 over the In (K) axis; w2 stays resident (O_p small).
        TK = 512 if In_p % 512 == 0 else (256 if In_p % 256 == 0 else 128)
        nK = In_p // TK
        grid = (Bp // TB, nK)
        in_specs = [
            pl.BlockSpec((TB, TK), lambda i, k: (i, k)),    # x: (batch, K) tiles
            pl.BlockSpec((TK, H_p), lambda i, k: (k, 0)),   # w1: streamed over In
            pl.BlockSpec((1, H_p), lambda i, k: (0, 0)),
            pl.BlockSpec((H_p, O_p), lambda i, k: (0, 0)),  # w2: resident
            pl.BlockSpec((1, O_p), lambda i, k: (0, 0)),
        ]
        out_specs = pl.BlockSpec((TB, O_p), lambda i, k: (i, 0))
        scratch_shapes = [pltpu.VMEM((TB, H_p), jnp.float32)]
        kernel = mlp_kernel_kstream
        dims = ("parallel", "arbitrary")
        need = (2 * TB * TK * op_bytes        # double-buffered x tiles
                + 2 * TK * H_p * op_bytes     # double-buffered w1 slabs
                + 2 * TB * O_p * out_bytes    # double-buffered out tiles
                + H_p * O_p * op_bytes + (H_p + O_p) * 4
                + TB * H_p * 4                # f32 accumulator scratch
                + 2 * TB * H_p * 4)           # fc2 intermediate headroom

    # Always set the VMEM limit explicitly (v5e defaults to only 16 MiB),
    # with headroom, capped per generation, never below the computed need.
    vmem_limit = int(min(max(need + (8 << 20), 32 << 20), vmem_cap))

    # ---- advisory cost estimate for XLA's scheduler ------------------------
    cost = pl.CostEstimate(
        flops=2 * Bp * (In_p * H_p + H_p * O_p),
        transcendentals=2 * Bp * O_p,         # exp + reciprocal per element
        bytes_accessed=(Bp * In_p * op_bytes
                        + (In_p * H_p + H_p * O_p) * op_bytes
                        + (H_p + O_p) * 4
                        + Bp * O_p * out_bytes),
    )

    # NOTE: if profiling on v5e shows the x-tile DMA exposed, deepen the
    # input pipeline with pipeline_mode=pl.Buffered(3) on the x BlockSpec.
    out_padded = pl.pallas_call(
        kernel,
        out_shape=jax.ShapeDtypeStruct((Bp, O_p), out_dtype),
        grid_spec=pltpu.PrefetchScalarGridSpec(
            num_scalar_prefetch=0,
            grid=grid,
            in_specs=in_specs,
            out_specs=out_specs,
            scratch_shapes=scratch_shapes,
        ),
        compiler_params=pltpu.CompilerParams(
            dimension_semantics=dims,
            vmem_limit_bytes=vmem_limit,
        ),
        cost_estimate=cost,
    )(xp, w1p, b1p, w2p, b2p)

    return out_padded[:B, :O]


# --------------------------------------------------------------------------
# Params / reference
# --------------------------------------------------------------------------
def init_mlp_params(key, input_size=10, hidden_size=10, output_size=1,
                    dtype=jnp.float32):
    """Deterministic init mimicking PyTorch nn.Linear default (+-1/sqrt(fan_in))."""
    k1, k2, k3, k4 = jax.random.split(key, 4)
    bound1 = 1.0 / (input_size ** 0.5)
    bound2 = 1.0 / (hidden_size ** 0.5)
    # stored as (in_features, out_features): equivalent to PyTorch weight.T
    w1 = jax.random.uniform(k1, (input_size, hidden_size), dtype,
                            minval=-bound1, maxval=bound1)
    b1 = jax.random.uniform(k2, (1, hidden_size), dtype,
                            minval=-bound1, maxval=bound1)
    w2 = jax.random.uniform(k3, (hidden_size, output_size), dtype,
                            minval=-bound2, maxval=bound2)
    b2 = jax.random.uniform(k4, (1, output_size), dtype,
                            minval=-bound2, maxval=bound2)
    return w1, b1, w2, b2


def _ref_forward(x, w1, b1, w2, b2):
    h = jnp.maximum(x @ w1 + b1, 0.0)
    return jax.nn.sigmoid(h @ w2 + b2)


if __name__ == "__main__":
    key = jax.random.PRNGKey(0)
    kx1, kx2, kx3, kp1, kp2 = jax.random.split(key, 5)

    # Case 1: module-default sizes (In=10, H=10, O=1), default bf16 operands.
    w1, b1, w2, b2 = init_mlp_params(kp1, 10, 10, 1)
    x1 = jax.random.normal(kx1, (8, 10), jnp.float32)
    out1 = jax.block_until_ready(mlp_forward(x1, w1, b1, w2, b2))
    ref1 = _ref_forward(x1, w1, b1, w2, b2)
    assert out1.shape == (8, 1)
    assert bool(jnp.all(jnp.isfinite(out1)))
    assert jnp.allclose(out1, ref1, atol=3e-2, rtol=3e-2)

    # Case 2: ragged batch (B=13), small batch tile, full-f32 operands
    # (exercises batch padding + tight-tolerance path).
    x2 = jax.random.normal(kx2, (13, 10), jnp.float32)
    out2 = jax.block_until_ready(
        mlp_forward(x2, w1, b1, w2, b2, block_b=8, use_bf16=False))
    ref2 = _ref_forward(x2, w1, b1, w2, b2)
    assert out2.shape == (13, 1)
    assert jnp.allclose(out2, ref2, atol=5e-3, rtol=5e-3)

    # Case 3: K-streamed weight path (multi-step reduction grid) at a small
    # non-default size (In=300 -> 3 K slabs of 128), f32 operands.
    w1b, b1b, w2b, b2b = init_mlp_params(kp2, 300, 64, 3)
    x3 = jax.random.normal(kx3, (24, 300), jnp.float32)
    out3 = jax.block_until_ready(
        mlp_forward(x3, w1b, b1b, w2b, b2b, use_bf16=False,
                    force_k_stream=True))
    ref3 = _ref_forward(x3, w1b, b1b, w2b, b2b)
    assert out3.shape == (24, 3)
    assert jnp.allclose(out3, ref3, atol=5e-3, rtol=5e-3)

    print("KERNEL_OK")
</pallas_src>

<mosaic_0001>
module attributes {stable_mosaic.version = 11 : i64} {
  func.func @mlp_kernel_resident(%arg0: i32, %arg1: memref<16x128xbf16, #tpu.memory_space<vmem>>, %arg2: memref<128x128xbf16, #tpu.memory_space<vmem>>, %arg3: memref<1x128xf32, #tpu.memory_space<vmem>>, %arg4: memref<128x128xbf16, #tpu.memory_space<vmem>>, %arg5: memref<1x128xf32, #tpu.memory_space<vmem>>, %arg6: memref<16x128xf32, #tpu.memory_space<vmem>>) attributes {dimension_semantics = [#tpu.dimension_semantics<parallel>], iteration_bounds = array<i64: 1>, scalar_prefetch = 0 : i64, scratch_operands = 0 : i64, tpu.core_type = #tpu.core_type<tc>, window_params = [{transform_indices = @transform_0, window_bounds = array<i64: 16, 128>}, {pipeline_mode = #tpu.pipeline_mode<synchronous>, transform_indices = @transform_1, window_bounds = array<i64: 128, 128>}, {pipeline_mode = #tpu.pipeline_mode<synchronous>, transform_indices = @transform_2, window_bounds = array<i64: 1, 128>}, {pipeline_mode = #tpu.pipeline_mode<synchronous>, transform_indices = @transform_3, window_bounds = array<i64: 128, 128>}, {pipeline_mode = #tpu.pipeline_mode<synchronous>, transform_indices = @transform_4, window_bounds = array<i64: 1, 128>}, {transform_indices = @transform_5, window_bounds = array<i64: 16, 128>}]} {
    %c0 = arith.constant 0 : index
    %c0_0 = arith.constant 0 : index
    %0 = vector.load %arg1[%c0, %c0_0] : memref<16x128xbf16, #tpu.memory_space<vmem>>, vector<16x128xbf16>
    %c0_1 = arith.constant 0 : index
    %c0_2 = arith.constant 0 : index
    %1 = vector.load %arg2[%c0_1, %c0_2] : memref<128x128xbf16, #tpu.memory_space<vmem>>, vector<128x128xbf16>
    %cst = arith.constant dense<0.000000e+00> : vector<16x128xf32>
    %2 = tpu.matmul %0, %1, %cst {dimension_numbers = #tpu.dot_dimension_numbers<[1], [0], [0], [1], [0, 0, 1, 1], [], []>} : vector<16x128xbf16>, vector<128x128xbf16>, vector<16x128xf32> -> vector<16x128xf32>
    %c0_3 = arith.constant 0 : index
    %c0_4 = arith.constant 0 : index
    %3 = vector.load %arg3[%c0_3, %c0_4] : memref<1x128xf32, #tpu.memory_space<vmem>>, vector<1x128xf32>
    %4 = vector.broadcast %3 : vector<1x128xf32> to vector<16x128xf32>
    %5 = arith.addf %2, %4 : vector<16x128xf32>
    %cst_5 = arith.constant 0.000000e+00 : f32
    %6 = vector.broadcast %cst_5 : f32 to vector<16x128xf32>
    %7 = arith.maximumf %5, %6 : vector<16x128xf32>
    %8 = arith.truncf %7 : vector<16x128xf32> to vector<16x128xbf16>
    %c0_6 = arith.constant 0 : index
    %c0_7 = arith.constant 0 : index
    %9 = vector.load %arg4[%c0_6, %c0_7] : memref<128x128xbf16, #tpu.memory_space<vmem>>, vector<128x128xbf16>
    %cst_8 = arith.constant dense<0.000000e+00> : vector<16x128xf32>
    %10 = tpu.matmul %8, %9, %cst_8 {dimension_numbers = #tpu.dot_dimension_numbers<[1], [0], [0], [1], [0, 0, 1, 1], [], []>} : vector<16x128xbf16>, vector<128x128xbf16>, vector<16x128xf32> -> vector<16x128xf32>
    %c0_9 = arith.constant 0 : index
    %c0_10 = arith.constant 0 : index
    %11 = vector.load %arg5[%c0_9, %c0_10] : memref<1x128xf32, #tpu.memory_space<vmem>>, vector<1x128xf32>
    %12 = vector.broadcast %11 : vector<1x128xf32> to vector<16x128xf32>
    %13 = arith.addf %10, %12 : vector<16x128xf32>
    %cst_11 = arith.constant 0.000000e+00 : f32
    %14 = vector.broadcast %cst_11 : f32 to vector<16x128xf32>
    %15 = arith.subf %14, %13 : vector<16x128xf32>
    %16 = math.exp %15 : vector<16x128xf32>
    %cst_12 = arith.constant 1.000000e+00 : f32
    %17 = vector.broadcast %cst_12 : f32 to vector<16x128xf32>
    %18 = arith.addf %17, %16 : vector<16x128xf32>
    %19 = tpu.reciprocal %18 {approx = true} : vector<16x128xf32> -> vector<16x128xf32>
    %c0_13 = arith.constant 0 : index
    %c0_14 = arith.constant 0 : index
    %20 = vector.load %arg6[%c0_13, %c0_14] : memref<16x128xf32, #tpu.memory_space<vmem>>, vector<16x128xf32>
    tpu.vector_store %arg6[%c0_13, %c0_14], %19 {strides = array<i32>} : memref<16x128xf32, #tpu.memory_space<vmem>>, vector<16x128xf32>,
    return
  }
  func.func @transform_0(%arg0: i32) -> (i32, i32) {
    %c0_i32 = arith.constant 0 : i32
    %c0_i32_0 = arith.constant 0 : i32
    return %arg0, %c0_i32 : i32, i32
  }
  func.func @transform_1(%arg0: i32) -> (i32, i32) {
    %c0_i32 = arith.constant 0 : i32
    %c0_i32_0 = arith.constant 0 : i32
    %c0_i32_1 = arith.constant 0 : i32
    return %c0_i32, %c0_i32_0 : i32, i32
  }
  func.func @transform_2(%arg0: i32) -> (i32, i32) {
    %c0_i32 = arith.constant 0 : i32
    %c0_i32_0 = arith.constant 0 : i32
    %c0_i32_1 = arith.constant 0 : i32
    return %c0_i32, %c0_i32_0 : i32, i32
  }
  func.func @transform_3(%arg0: i32) -> (i32, i32) {
    %c0_i32 = arith.constant 0 : i32
    %c0_i32_0 = arith.constant 0 : i32
    %c0_i32_1 = arith.constant 0 : i32
    return %c0_i32, %c0_i32_0 : i32, i32
  }
  func.func @transform_4(%arg0: i32) -> (i32, i32) {
    %c0_i32 = arith.constant 0 : i32
    %c0_i32_0 = arith.constant 0 : i32
    %c0_i32_1 = arith.constant 0 : i32
    return %c0_i32, %c0_i32_0 : i32, i32
  }
  func.func @transform_5(%arg0: i32) -> (i32, i32) {
    %c0_i32 = arith.constant 0 : i32
    %c0_i32_0 = arith.constant 0 : i32
    return %arg0, %c0_i32 : i32, i32
  }
}

</mosaic_0001>

<bundles_post_ra>
// kernel: tpu_custom_call.1
= control target key start
LH: loop header
LB: loop body
LE: loop exit
PB: predicated region body
PF: predicated region fallthrough
CT: control target
= control target key end

     0   :  { %10 = vsyncpa [#allocation3], 0  ;;  %s644_s0 = inlined_call_operand.hbm [shape: bf16[16,128], index: 0, kind: input, shape index: {}]   ;;  %s645_s1 = inlined_call_operand.hbm [shape: bf16[128,128], index: 1, kind: input, shape index: {}]   ;;  %s646_s2 = inlined_call_operand.vmem [shape: f32[1,128], index: 2, kind: input, shape index: {}]   ;;  %s647_s3 = inlined_call_operand.hbm [shape: bf16[128,128], index: 3, kind: input, shape index: {}]   ;;  %s648_s4 = inlined_call_operand.vmem [shape: f32[1,128], index: 4, kind: input, shape index: {}]   ;;  %s649_s5 = inlined_call_operand.hbm [shape: f32[16,128], index: 5, kind: output, shape index: {}]  }
   0x1   :  { %11 = vsyncpa [#allocation6], 0 }
   0x2   :  { %12 = vsyncpa [#allocation4], 0  ;;  %s534_s18 = smov [#allocation5]   ;;  %s535_s20 = smov [#allocation2]  }
   0x3   :  { %s30_s19 = sshll.u32 %s534_s18, 4  ;;  %s18_s21 = sshll.u32 %s535_s20, 4  ;;  %s31_s19 = int_to_ptr.vmem [resolvable:$true] %s30_s19  ;;  %s574_s21 = int_to_ptr.vmem [resolvable:$true] %s18_s21 }
   0x4   :  { %s440_s24 = scalar_lea.hbm %s645_s1, 1024 }
   0x5   :  { %p441_p0 = scmp.ne.s32.totalorder %s645_s1, %s440_s24  ;;  %p444_p1 = scmp.lt.u32.totalorder %s440_s24, %s645_s1 }
   0x7   :  { %p446_p2 = pnand %p444_p1, %p441_p0 }
   0x9   :  { %449 = shalt.err (!%p446_p2)
}
   0xa   :  { %s450_s29 = scalar_lea.vmem %s31_s19, 1024  ;;  %p455_p4 = scmp.lt.s32.totalorder %s31_s19, %s31_s19 }
   0xb   :  { %p451_p3 = scmp.ne.s32.totalorder %s31_s19, %s450_s29  ;;  %p456_p5 = scmp.lt.s32.totalorder %s450_s29, %s450_s29 }
   0xd   :  { %p457_p6 = por %p456_p5, %p455_p4 }
   0xf   :  { %p458_p7 = pnand %p457_p6, %p451_p3 }
  0x11   :  { %461 = shalt.err (!%p458_p7)
}
  0x12   :  { %s536_s30 = smov 64   ;;  %s537_s6 = smov 4  }
  0x13   :  { %36 = dma.hbm_to_vmem [thread:$0]  %s645_s1, 1024, %s31_s19, [#allocation6], %s536_s30, %s536_s30, %s537_s6  }
  0x14   :  { %s462_s11 = scalar_lea.hbm %s644_s0, 128 }
  0x15   :  { %p463_p8 = scmp.ne.s32.totalorder %s644_s0, %s462_s11  ;;  %p466_p9 = scmp.lt.u32.totalorder %s462_s11, %s644_s0 }
  0x17   :  { %p468_p10 = pnand %p466_p9, %p463_p8 }
  0x19   :  { %471 = shalt.err (!%p468_p10)
}
  0x1a   :  { %s472_s16 = scalar_lea.vmem %s574_s21, 128  ;;  %p477_p12 = scmp.lt.s32.totalorder %s574_s21, %s574_s21 }
  0x1b   :  { %p473_p11 = scmp.ne.s32.totalorder %s574_s21, %s472_s16  ;;  %p478_p13 = scmp.lt.s32.totalorder %s472_s16, %s472_s16 }
  0x1d   :  { %p479_p0 = por %p478_p13, %p477_p12 }
  0x1f   :  { %p480_p1 = pnand %p479_p0, %p473_p11 }
  0x21   :  { %483 = shalt.err (!%p480_p1)
}
  0x22   :  { %24 = dma.hbm_to_vmem [thread:$0]  %s644_s0, 128, %s574_s21, [#allocation3], %s536_s30, %s536_s30, %s537_s6  }
  0x23   :  { %s538_s18 = smov [#allocation7]   ;;  %s484_s23 = scalar_lea.hbm %s647_s3, 1024 }
  0x24   :  { %s44_s19 = sshll.u32 %s538_s18, 4  ;;  %p485_p2 = scmp.ne.s32.totalorder %s647_s3, %s484_s23  ;;  %s45_s19 = int_to_ptr.vmem [resolvable:$true] %s44_s19 }
  0x25   :  { %p488_p3 = scmp.lt.u32.totalorder %s484_s23, %s647_s3 }
  0x27   :  { %p490_p4 = pnand %p488_p3, %p485_p2 }
  0x29   :  { %493 = shalt.err (!%p490_p4)
}
  0x2a   :  { %s494_s28 = scalar_lea.vmem %s45_s19, 1024  ;;  %p499_p6 = scmp.lt.s32.totalorder %s45_s19, %s45_s19 }
  0x2b   :  { %p495_p5 = scmp.ne.s32.totalorder %s45_s19, %s494_s28  ;;  %p500_p7 = scmp.lt.s32.totalorder %s494_s28, %s494_s28 }
  0x2d   :  { %p501_p8 = por %p500_p7, %p499_p6 }
  0x2f   :  { %p502_p9 = pnand %p501_p8, %p495_p5 }
  0x31   :  { %505 = shalt.err (!%p502_p9)
}
  0x32   :  { %50 = dma.hbm_to_vmem [thread:$0]  %s647_s3, 1024, %s45_s19, [#allocation6], %s536_s30, %s536_s30, %s537_s6  }
  0x33   :  { %528 = dma.done.wait [#allocation3], 128  }
  0x34   :  { %529 = vsyncadd [#allocation3], 4294967168 }
  0x35   :  { %530 = dma.done.wait [#allocation6], 2048  }
  0x36   :  { %531 = vsyncadd [#allocation6], 4294965248  ;;  %v539_v0 = vmov 0.0   ;;  %vm540_vm0 = vmmov 0   ;;  %v415_v1 = vld [vmem:[#allocation5] sm:$0xff]   ;;  %v416_v2 = vld [vmem:[#allocation5 + $0x8] sm:$0xff]  }
  0x37   :  { %365 = vmatprep.subr.bf16.mxu0 %v539_v0  ;;  %381 = vmatprep.mubr.msk.bf16.mxu0 %vm540_vm0, %v539_v0  ;;  %v417_v3 = vld [vmem:[#allocation5 + $0x10] sm:$0xff]   ;;  %v424_v4 = vld [vmem:[#allocation7] sm:$0xff]   ;;  %v418_v5 = vld [vmem:[#allocation5 + $0x18] sm:$0xff]  }
  0x38   :  { %385 = vmatprep.subr.bf16.mxu1 %v539_v0  ;;  %401 = vmatprep.mubr.msk.bf16.mxu1 %vm540_vm0, %v539_v0  ;;  %v425_v6 = vld [vmem:[#allocation7 + $0x8] sm:$0xff]   ;;  %v419_v7 = vld [vmem:[#allocation5 + $0x20] sm:$0xff]   ;;  %v426_v8 = vld [vmem:[#allocation7 + $0x10] sm:$0xff]  }
  0x39   :  { %366 = vmatpush3.bf16.msra.mxu0 %v415_v1  ;;  %386 = vmatpush3.bf16.msra.mxu1 %v424_v4  ;;  %v420_v9 = vld [vmem:[#allocation5 + $0x28] sm:$0xff]   ;;  %v427_v10 = vld [vmem:[#allocation7 + $0x18] sm:$0xff]   ;;  %v421_v11 = vld [vmem:[#allocation5 + $0x30] sm:$0xff]  }
  0x3a   :  { %367 = vmatprep.subr.bf16.mxu0 %v539_v0  ;;  %387 = vmatprep.subr.bf16.mxu1 %v539_v0  ;;  %v428_v12 = vld [vmem:[#allocation7 + $0x20] sm:$0xff]   ;;  %v422_v13 = vld [vmem:[#allocation5 + $0x38] sm:$0xff]   ;;  %v429_v14 = vld [vmem:[#allocation7 + $0x28] sm:$0xff]  }
  0x3b   :  { %v423_v15 = vld [vmem:[#allocation2] sm:$0xff]   ;;  %v430_v16 = vld [vmem:[#allocation7 + $0x30] sm:$0xff]  }
  0x3c   :  { %v431_v17 = vld [vmem:[#allocation7 + $0x38] sm:$0xff]  }
  0x3d   :  { %368 = vmatpush3.bf16.msra.mxu0 %v416_v2  ;;  %388 = vmatpush3.bf16.msra.mxu1 %v425_v6  ;;  %v328_v18 = vld [vmem:[%s646_s2] ss:$0 sm:$0xff]  ;;  %s541_s2 = smov [#allocation8]  }
  0x3e   :  { %369 = vmatprep.subr.bf16.mxu0 %v539_v0  ;;  %389 = vmatprep.subr.bf16.mxu1 %v539_v0  ;;  %v338_v28 = vld [vmem:[%s648_s4] ss:$0 sm:$0xff]  ;;  %s315_s4 = sshll.u32 %s541_s2, 4  ;;  %s316_s4 = int_to_ptr.vmem [resolvable:$true] %s315_s4 }
  0x3f   :  { %s506_s7 = scalar_lea.vmem %s316_s4, 256  ;;  %p511_p11 = scmp.lt.s32.totalorder %s316_s4, %s316_s4 }
  0x40   :  { %p507_p10 = scmp.ne.s32.totalorder %s316_s4, %s506_s7  ;;  %p512_p12 = scmp.lt.s32.totalorder %s506_s7, %s506_s7 }
  0x41   :  { %370 = vmatpush3.bf16.msra.mxu0 %v417_v3  ;;  %390 = vmatpush3.bf16.msra.mxu1 %v426_v8 }
  0x42   :  { %371 = vmatprep.subr.bf16.mxu0 %v539_v0  ;;  %391 = vmatprep.subr.bf16.mxu1 %v539_v0  ;;  %p513_p13 = por %p512_p12, %p511_p11 }
  0x44   :  { %p514_p0 = pnand %p513_p13, %p507_p10 }
  0x45   :  { %372 = vmatpush3.bf16.msra.mxu0 %v418_v5  ;;  %392 = vmatpush3.bf16.msra.mxu1 %v427_v10 }
  0x46   :  { %373 = vmatprep.subr.bf16.mxu0 %v539_v0  ;;  %393 = vmatprep.subr.bf16.mxu1 %v539_v0 }
  0x49   :  { %374 = vmatpush3.bf16.msra.mxu0 %v419_v7  ;;  %394 = vmatpush3.bf16.msra.mxu1 %v428_v12 }
  0x4a   :  { %375 = vmatprep.subr.bf16.mxu0 %v539_v0  ;;  %395 = vmatprep.subr.bf16.mxu1 %v539_v0 }
  0x4d   :  { %376 = vmatpush3.bf16.msra.mxu0 %v420_v9  ;;  %396 = vmatpush3.bf16.msra.mxu1 %v429_v14 }
  0x4e   :  { %377 = vmatprep.subr.bf16.mxu0 %v539_v0  ;;  %397 = vmatprep.subr.bf16.mxu1 %v539_v0 }
  0x51   :  { %378 = vmatpush3.bf16.msra.mxu0 %v421_v11  ;;  %398 = vmatpush3.bf16.msra.mxu1 %v430_v16 }
  0x52   :  { %379 = vmatprep.subr.bf16.mxu0 %v539_v0  ;;  %399 = vmatprep.subr.bf16.mxu1 %v539_v0 }
  0x55   :  { %380 = vmatpush3.bf16.msra.mxu0 %v422_v13  ;;  %400 = vmatpush3.bf16.msra.mxu1 %v431_v17 }
  0x58   :  { %382 = vmatmul.mubr.bf16.vlgmr.msra.gmra.mrb[0].mxu0 %v423_v15 }
 0x12b   :  { %v176_v19 = vpop.f32.mrb[0].mxu0 }
 0x12c   :  { %v177_v20 = vadd.f32 %v328_v18, %v176_v19  ;;  %v383_v21 = vpop.f32.mrb[1].mxu0 }
 0x12d   :  { %v179_v22 = vpop.f32.mrb[2].mxu0 }
 0x12e   :  { %v180_v23 = vadd.f32 %v328_v18, %v179_v22  ;;  %v384_v24 = vpop.f32.mrb[3].mxu0  ;;  %v183_v25 = vmax.f32 %v177_v20, 0.0 }
 0x130   :  { %v184_v26 = vmax.f32 %v180_v23, 0.0 }
 0x132   :  { %v185_v27 = vpack.c.bf16 %v184_v26, %v183_v25 }
 0x134   :  { %402 = vmatmul.mubr.bf16.vlgmr.msra.gmra.mrb[0].mxu1 %v185_v27 }
 0x207   :  { %v291_v29 = vpop.f32.mrb[0].mxu1 }
 0x208   :  { %v292_v30 = vadd.f32 %v338_v28, %v291_v29  ;;  %v403_v31 = vpop.f32.mrb[1].mxu1 }
 0x209   :  { %v294_v32 = vpop.f32.mrb[2].mxu1 }
 0x20a   :  { %v298_v33 = vsub.f32 0.0, %v292_v30  ;;  %v295_v34 = vadd.f32 %v338_v28, %v294_v32  ;;  %v404_v35 = vpop.f32.mrb[3].mxu1 }
 0x20c   :  { %v300_v36 = vmul.f32 1.442695, %v298_v33  ;;  %v299_v37 = vsub.f32 0.0, %v295_v34 }
 0x20e   :  { %432 = vpow2.f32 %v300_v36  ;;  %v302_v38 = vmul.f32 1.442695, %v299_v37 }
 0x210   :  { %434 = vpow2.f32 %v302_v38 }
 0x218   :  { %v433_v39 = vpop.eup %432 }
 0x219   :  { %v304_v40 = vadd.f32 1.0, %v433_v39 }
 0x21a   :  { %v435_v41 = vpop.eup %434 }
 0x21b   :  { %436 = vrcp.f32 %v304_v40  ;;  %v305_v42 = vadd.f32 1.0, %v435_v41 }
 0x21d   :  { %438 = vrcp.f32 %v305_v42 }
 0x225   :  { %v437_v43 = vpop.eup %436 }
 0x226   :  { %308 = vst [vmem:[#allocation8] sm:$0xff] %v437_v43 }
 0x227   :  { %v439_v44 = vpop.eup %438 }
 0x228   :  { %309 = vst [vmem:[#allocation8 + $0x8] sm:$0xff] %v439_v44 }
 0x229   :  { %517 = shalt.err (!%p514_p0)
}
 0x22a   :  { %s518_s10 = scalar_lea.hbm %s649_s5, 256 }
 0x22b   :  { %p519_p1 = scmp.ne.s32.totalorder %s649_s5, %s518_s10  ;;  %p522_p2 = scmp.lt.u32.totalorder %s518_s10, %s649_s5 }
 0x22d   :  { %p524_p3 = pnand %p522_p2, %p519_p1 }
 0x22f   :  { %527 = shalt.err (!%p524_p3)
}
 0x230   :  { %s542_s15 = smov 128   ;;  %s543_s16 = smov 8  }
 0x231   :  { %321 = dma.vmem_to_hbm [thread:$0]  %s316_s4, 256, %s649_s5, [#allocation4], %s542_s15, %s542_s15, %s543_s16  }
 0x232   :  { %532 = dma.done.wait [#allocation4], 256  }
 0x233   :  { %533 = vsyncadd [#allocation4], 4294967040 }
 0x234   :  { %325 = vsyncpa [#allocation3], 1 }
 0x235   :  { %326 = vsyncpa [#allocation6], 1 }
 0x236   :  { %327 = vsyncpa [#allocation4], 1 }

</bundles_post_ra>
